<compile_context>
chip_gen: v7x
topology: tpu7x:2x2x1
jax: 0.10.0
libtpu: 0.0.40
codegen_flags: <defaults>
</compile_context>

<pallas_src>
import functools

import numpy as np
import jax
import jax.numpy as jnp
from jax import lax
from jax.experimental import pallas as pl
from jax.experimental.pallas import tpu as pltpu


# ----------------------------------------------------------------------------- kernels
def _down_kernel(p_ref, w_ref, d_ref):
    # p_ref: (16*Cin, TM) bf16 im2col patches of x ; w_ref: (Cd, 16*Cin) bf16
    p = p_ref[...].astype(jnp.float32)
    p = jnp.where(p >= 0.0, p, 0.2 * p)                      # LeakyReLU(0.2) in f32
    d = jnp.dot(w_ref[...], p.astype(jnp.bfloat16),
                preferred_element_type=jnp.float32)          # bf16 MXU, f32 accum
    d_ref[...] = jnp.maximum(d, 0.0).astype(d_ref.dtype)     # ReLU, stored bf16


def _up_kernel(p_ref, w_ref, u_ref, st_ref, *, m_real, tm, masked):
    # p_ref: (9*Cd, TM) bf16 3x3 neighborhoods of d ; w_ref: (4*Cout, 9*Cd) bf16
    # u_ref: (4*Cout, TM) bf16 (all 4 output phases) ; st_ref: (1, 4*Cout, 2) f32
    u = jnp.dot(w_ref[...], p_ref[...], preferred_element_type=jnp.float32)
    u_ref[...] = u.astype(u_ref.dtype)

    # Per-block BatchNorm partials from the f32 accumulator (before the bf16 downcast):
    # row sum and centered M2 per (phase, cout) row -> exact Chan combine in the wrapper.
    if masked:
        col = pl.program_id(0) * tm + lax.broadcasted_iota(jnp.int32, u.shape, 1)
        valid = col < m_real
        u_src = jnp.where(valid, u, 0.0)
        n = jnp.minimum(jnp.maximum(m_real - pl.program_id(0) * tm, 1), tm)
        n = n.astype(jnp.float32)
    else:
        u_src = u
        n = float(tm)
    rsum = jnp.sum(u_src, axis=1, keepdims=True)             # (4*Cout, 1)
    diff = u - rsum * (1.0 / n)
    if masked:
        diff = jnp.where(valid, diff, 0.0)
    st_ref[0, :, 0:1] = rsum
    st_ref[0, :, 1:2] = jnp.sum(diff * diff, axis=1, keepdims=True)


def _bn_kernel(u_ref, mean_ref, var_ref, g_ref, b_ref, y_ref, *, eps):
    # u_ref: (Cout, TM) bf16 ; mean/var/g/b: (Cout, 1) f32 ; y_ref: (Cout, TM) f32
    scale = lax.rsqrt(var_ref[...] + eps) * g_ref[...]
    y_ref[...] = (u_ref[...].astype(jnp.float32) - mean_ref[...]) * scale + b_ref[...]


# ----------------------------------------------------------------------------- helpers
def _round_up(x, m):
    return (x + m - 1) // m * m


def _vmem_limit_bytes():
    """Generation-aware scoped-VMEM limit (v7x has 64 MiB physical per TC)."""
    try:
        kind = jax.devices()[0].device_kind.lower()
    except Exception:
        return 48 * 1024 * 1024
    if "v7" in kind or "7x" in kind:
        return 48 * 1024 * 1024
    return 64 * 1024 * 1024


def _pick_tile(m_pad, stream_bytes_per_col, target, budget_bytes):
    """Largest 128-multiple lane tile <= target dividing m_pad, within the VMEM budget."""
    cap = max(128, (budget_bytes // max(stream_bytes_per_col, 1)) // 128 * 128)
    t = min(target, m_pad, cap)
    t = max(128, (t // 128) * 128)
    while m_pad % t:
        t -= 128
    return t


def _pad_lanes(a, m_pad):
    m = a.shape[-1]
    if m == m_pad:
        return a
    return jnp.pad(a, [(0, 0)] * (a.ndim - 1) + [(0, m_pad - m)])


def _cparams(sem, vmem_limit):
    return pltpu.CompilerParams(dimension_semantics=sem, vmem_limit_bytes=vmem_limit)


# ----------------------------------------------------------------------------- wrapper
def unet_innermost_block(x_nchw, params, *, eps=1e-5, lane_tile=1024):
    # TODO(synk): only the self-contained `innermost` UnetSkipConnectionBlock variant is
    # implemented; outermost/middle variants recursively wrap a submodule and compose this block.
    # TODO(synk): layout assumes pixel-count >= 128 on the lane axis; the true innermost config
    # (inner_nc~512, 2x2 spatial) would want channels on lanes instead.
    wd, wu, gamma, beta = params
    N, Cin, H, W = x_nchw.shape
    Cd = wd.shape[0]              # inner_nc
    Cout = wu.shape[1]            # outer_nc
    assert H % 2 == 0 and W % 2 == 0
    Ho, Wo = H // 2, W // 2
    M1 = N * Ho * Wo              # down-conv output pixels
    M = N * H * W                 # up-conv / BN pixels
    f32, bf16 = jnp.float32, jnp.bfloat16

    vmem_limit = _vmem_limit_bytes()
    budget = (vmem_limit * 3) // 5          # leave headroom for weights/pipelining
    M1p = _round_up(M1, 128)
    Mp = _round_up(M, 128)

    # ---- layout glue (XLA, bf16): im2col patches of x for the 4x4/s2 down conv.
    # TODO(synk): patch/window extraction stays XLA glue; fusing it into Pallas via
    # manually-DMA'd overlapping windows of padded d is the remaining HBM-traffic win.
    x_nhwc = jnp.transpose(x_nchw, (0, 2, 3, 1)).astype(bf16)
    xpad = jnp.pad(x_nhwc, ((0, 0), (1, 1), (1, 1), (0, 0)))
    taps = [xpad[:, kh:kh + 2 * Ho:2, kw:kw + 2 * Wo:2, :]
            for kh in range(4) for kw in range(4)]                    # each (N,Ho,Wo,Cin)
    p_t = (jnp.stack(taps, axis=3)                                    # (N,Ho,Wo,16,Cin)
             .transpose(3, 4, 0, 1, 2).reshape(16 * Cin, M1))         # rows=(tap,ci), cols=pixel
    p_t = _pad_lanes(p_t, M1p)
    wd_t = wd.transpose(0, 2, 3, 1).reshape(Cd, 16 * Cin).astype(bf16)

    # ---- call A: LeakyReLU + down conv (single GEMM) + ReLU -> d^T (Cd, M1p) bf16
    tm1 = _pick_tile(M1p, 2 * 2 * (16 * Cin + Cd), lane_tile, budget)
    d_t = pl.pallas_call(
        _down_kernel,
        out_shape=jax.ShapeDtypeStruct((Cd, M1p), bf16),
        grid=(M1p // tm1,),
        in_specs=[pl.BlockSpec((16 * Cin, tm1), lambda i: (0, i)),
                  pl.BlockSpec((Cd, 16 * Cin), lambda i: (0, 0))],
        out_specs=pl.BlockSpec((Cd, tm1), lambda i: (0, i)),
        compiler_params=_cparams(("parallel",), vmem_limit),
        cost_estimate=pl.CostEstimate(flops=2 * M1p * 16 * Cin * Cd, transcendentals=0,
                                      bytes_accessed=2 * M1p * (16 * Cin + Cd)
                                                     + 2 * Cd * 16 * Cin),
    )(p_t, wd_t)

    # ---- layout glue: 3x3 neighborhoods of padded d (covers all 4 transposed-conv phases).
    d_sp = d_t[:, :M1].reshape(Cd, N, Ho, Wo)
    d_pad = jnp.pad(d_sp, ((0, 0), (0, 0), (1, 1), (1, 1)))
    taps9 = [d_pad[:, :, a:a + Ho, b:b + Wo] for a in range(3) for b in range(3)]
    p9 = _pad_lanes(jnp.stack(taps9, axis=0).reshape(9 * Cd, M1), M1p)

    # Zero-padded big weight (4*Cout, 9*Cd): row block = output phase (ph,pw), col block = tap.
    blocks = []
    for ph in (0, 1):
        for pw in (0, 1):
            row = []
            for a in range(3):
                kh = ph + 3 - 2 * a
                for b in range(3):
                    kw = pw + 3 - 2 * b
                    if 0 <= kh <= 3 and 0 <= kw <= 3:
                        row.append(wu[:, :, kh, kw].T)                # (Cout, Cd)
                    else:
                        row.append(jnp.zeros((Cout, Cd), wu.dtype))
            blocks.append(jnp.concatenate(row, axis=1))               # (Cout, 9*Cd)
    wbig = jnp.concatenate(blocks, axis=0).astype(bf16)               # (4*Cout, 9*Cd)

    # ---- call B: transposed conv (one GEMM per tile, all phases) + per-block BN partials
    tmb = _pick_tile(M1p, 2 * 2 * (9 * Cd + 4 * Cout), lane_tile, budget)
    Gb = M1p // tmb
    u4, stats = pl.pallas_call(
        functools.partial(_up_kernel, m_real=M1, tm=tmb, masked=(M1p != M1)),
        out_shape=(jax.ShapeDtypeStruct((4 * Cout, M1p), bf16),
                   jax.ShapeDtypeStruct((Gb, 4 * Cout, 2), f32)),
        grid=(Gb,),
        in_specs=[pl.BlockSpec((9 * Cd, tmb), lambda i: (0, i)),
                  pl.BlockSpec((4 * Cout, 9 * Cd), lambda i: (0, 0))],
        out_specs=(pl.BlockSpec((4 * Cout, tmb), lambda i: (0, i)),
                   pl.BlockSpec((1, 4 * Cout, 2), lambda i: (i, 0, 0))),
        compiler_params=_cparams(("parallel",), vmem_limit),
        cost_estimate=pl.CostEstimate(
            flops=2 * M1p * 9 * Cd * 4 * Cout + 6 * M1p * 4 * Cout, transcendentals=0,
            bytes_accessed=2 * M1p * (9 * Cd + 4 * Cout) + 2 * 4 * Cout * 9 * Cd
                           + 4 * Gb * 4 * Cout * 2),
    )(p9, wbig)

    # ---- exact global BN stats via Chan's parallel-variance combine (tiny, wrapper side).
    counts = np.minimum(tmb, M1 - tmb * np.arange(Gb)).astype(np.float32)   # valid cols/block
    st = stats.reshape(Gb, 4, Cout, 2)
    rsum, m2 = st[..., 0], st[..., 1]                                       # (Gb, 4, Cout)
    n_g = jnp.asarray(counts).reshape(Gb, 1, 1)
    m_tot = float(M)                                                        # = 4 * M1
    mean = jnp.sum(rsum, axis=(0, 1)) / m_tot                               # (Cout,)
    var = (jnp.sum(m2, axis=(0, 1))
           + jnp.sum(n_g * (rsum / n_g - mean) ** 2, axis=(0, 1))) / m_tot  # biased variance

    # ---- layout glue: interleave the 4 output phases back to (Cout, N*H*W), bf16.
    u_t = (u4[:, :M1].reshape(2, 2, Cout, N, Ho, Wo)
              .transpose(2, 3, 4, 0, 5, 1).reshape(Cout, M))
    u_t = _pad_lanes(u_t, Mp)
    mean_c = mean.reshape(Cout, 1).astype(f32)
    var_c = var.reshape(Cout, 1).astype(f32)
    g_c = gamma.reshape(Cout, 1).astype(f32)
    b_c = beta.reshape(Cout, 1).astype(f32)

    # ---- call C: BatchNorm normalize (training-mode batch stats) -> y^T (Cout, Mp) f32
    tmc = _pick_tile(Mp, 2 * (2 * Cout + 4 * Cout), lane_tile, budget)
    y_t = pl.pallas_call(
        functools.partial(_bn_kernel, eps=eps),
        out_shape=jax.ShapeDtypeStruct((Cout, Mp), f32),
        grid=(Mp // tmc,),
        in_specs=[pl.BlockSpec((Cout, tmc), lambda i: (0, i)),
                  pl.BlockSpec((Cout, 1), lambda i: (0, 0)),
                  pl.BlockSpec((Cout, 1), lambda i: (0, 0)),
                  pl.BlockSpec((Cout, 1), lambda i: (0, 0)),
                  pl.BlockSpec((Cout, 1), lambda i: (0, 0))],
        out_specs=pl.BlockSpec((Cout, tmc), lambda i: (0, i)),
        compiler_params=_cparams(("parallel",), vmem_limit),
        cost_estimate=pl.CostEstimate(flops=4 * Cout * Mp, transcendentals=Cout,
                                      bytes_accessed=(2 + 4) * Cout * Mp + 16 * Cout),
    )(u_t, mean_c, var_c, g_c, b_c)

    # ---- skip connection: pure layout, no x round-trip through any kernel.
    y = y_t[:, :M].reshape(Cout, N, H, W).transpose(1, 0, 2, 3)
    return jnp.concatenate([x_nchw, y], axis=1)


# ----------------------------------------------------------------------------- reference
def _reference(x_nchw, wd, wu, gamma, beta, eps=1e-5):
    # Pure-JAX reference (lax convs), mirroring the kernel's bf16 operand / f32 accum path.
    bf16, f32 = jnp.bfloat16, jnp.float32
    xr = x_nchw.astype(bf16).astype(f32)              # kernel streams x patches as bf16
    xl = jnp.where(xr >= 0, xr, 0.2 * xr)
    d = lax.conv_general_dilated(
        xl.astype(bf16), wd.astype(bf16), window_strides=(2, 2),
        padding=((1, 1), (1, 1)), dimension_numbers=("NCHW", "OIHW", "NCHW"),
        preferred_element_type=f32)
    r = jnp.maximum(d, 0.0)
    wuf = jnp.flip(wu, (2, 3)).transpose(1, 0, 2, 3)  # ConvTranspose2d == dilated conv
    u = lax.conv_general_dilated(
        r.astype(bf16), wuf.astype(bf16), window_strides=(1, 1),
        padding=((2, 2), (2, 2)), lhs_dilation=(2, 2),
        dimension_numbers=("NCHW", "OIHW", "NCHW"),
        preferred_element_type=f32)
    mean = jnp.mean(u, axis=(0, 2, 3), keepdims=True)
    var = jnp.mean((u - mean) ** 2, axis=(0, 2, 3), keepdims=True)
    y = (u - mean) * lax.rsqrt(var + eps) * gamma.reshape(1, -1, 1, 1) + beta.reshape(1, -1, 1, 1)
    return jnp.concatenate([x_nchw, y], axis=1)


if __name__ == "__main__":
    key = jax.random.PRNGKey(0)
    kx, kd, ku = jax.random.split(key, 3)

    N, H, W = 2, 16, 16
    outer_nc = 4                 # input_nc defaults to outer_nc in the module
    inner_nc = 8
    x = jax.random.normal(kx, (N, outer_nc, H, W), jnp.float32)
    wd = 0.2 * jax.random.normal(kd, (inner_nc, outer_nc, 4, 4), jnp.float32)  # Conv2d weight
    wu = 0.2 * jax.random.normal(ku, (inner_nc, outer_nc, 4, 4), jnp.float32)  # ConvTranspose2d weight
    gamma = jnp.ones((outer_nc,), jnp.float32)   # BatchNorm2d affine defaults
    beta = jnp.zeros((outer_nc,), jnp.float32)
    params = (wd, wu, gamma, beta)

    out = jax.jit(unet_innermost_block)(x, params)
    out = jax.block_until_ready(out)
    assert out.shape == (N, 2 * outer_nc, H, W), out.shape

    ref = _reference(x, wd, wu, gamma, beta)
    err = float(jnp.max(jnp.abs(out - ref)))
    assert jnp.allclose(out, ref, atol=5e-3, rtol=5e-3), f"mismatch vs reference, max|err|={err}"

    print("KERNEL_OK")
</pallas_src>

<mosaic_0001>
module attributes {stable_mosaic.version = 11 : i64} {
  func.func @_down_kernel(%arg0: i32, %arg1: memref<64x128xbf16, #tpu.memory_space<vmem>>, %arg2: memref<8x64xbf16, #tpu.memory_space<vmem>>, %arg3: memref<8x128xbf16, #tpu.memory_space<vmem>>) attributes {dimension_semantics = [#tpu.dimension_semantics<parallel>], iteration_bounds = array<i64: 1>, scalar_prefetch = 0 : i64, scratch_operands = 0 : i64, tpu.core_type = #tpu.core_type<tc>, window_params = [{transform_indices = @transform_0, window_bounds = array<i64: 64, 128>}, {pipeline_mode = #tpu.pipeline_mode<synchronous>, transform_indices = @transform_1, window_bounds = array<i64: 8, 64>}, {transform_indices = @transform_2, window_bounds = array<i64: 8, 128>}]} {
    %c0 = arith.constant 0 : index
    %c0_0 = arith.constant 0 : index
    %0 = vector.load %arg1[%c0, %c0_0] : memref<64x128xbf16, #tpu.memory_space<vmem>>, vector<64x128xbf16>
    %1 = arith.extf %0 : vector<64x128xbf16> to vector<64x128xf32>
    %cst = arith.constant 0.000000e+00 : f32
    %2 = vector.broadcast %cst : f32 to vector<64x128xf32>
    %3 = arith.cmpf oge, %1, %2 : vector<64x128xf32>
    %cst_1 = arith.constant 2.000000e-01 : f32
    %4 = vector.broadcast %cst_1 : f32 to vector<64x128xf32>
    %5 = arith.mulf %4, %1 : vector<64x128xf32>
    %6 = arith.select %3, %1, %5 : vector<64x128xi1>, vector<64x128xf32>
    %c0_2 = arith.constant 0 : index
    %c0_3 = arith.constant 0 : index
    %7 = vector.load %arg2[%c0_2, %c0_3] : memref<8x64xbf16, #tpu.memory_space<vmem>>, vector<8x64xbf16>
    %8 = arith.truncf %6 : vector<64x128xf32> to vector<64x128xbf16>
    %cst_4 = arith.constant dense<0.000000e+00> : vector<8x128xf32>
    %9 = tpu.matmul %7, %8, %cst_4 {dimension_numbers = #tpu.dot_dimension_numbers<[1], [0], [0], [1], [0, 0, 1, 1], [], []>} : vector<8x64xbf16>, vector<64x128xbf16>, vector<8x128xf32> -> vector<8x128xf32>
    %cst_5 = arith.constant 0.000000e+00 : f32
    %10 = vector.broadcast %cst_5 : f32 to vector<8x128xf32>
    %11 = arith.maximumf %9, %10 : vector<8x128xf32>
    %12 = arith.truncf %11 : vector<8x128xf32> to vector<8x128xbf16>
    %c0_6 = arith.constant 0 : index
    %c0_7 = arith.constant 0 : index
    %13 = vector.load %arg3[%c0_6, %c0_7] : memref<8x128xbf16, #tpu.memory_space<vmem>>, vector<8x128xbf16>
    tpu.vector_store %arg3[%c0_6, %c0_7], %12 {strides = array<i32>} : memref<8x128xbf16, #tpu.memory_space<vmem>>, vector<8x128xbf16>,
    return
  }
  func.func @transform_0(%arg0: i32) -> (i32, i32) {
    %c0_i32 = arith.constant 0 : i32
    %c0_i32_0 = arith.constant 0 : i32
    return %c0_i32, %arg0 : i32, i32
  }
  func.func @transform_1(%arg0: i32) -> (i32, i32) {
    %c0_i32 = arith.constant 0 : i32
    %c0_i32_0 = arith.constant 0 : i32
    %c0_i32_1 = arith.constant 0 : i32
    return %c0_i32, %c0_i32_0 : i32, i32
  }
  func.func @transform_2(%arg0: i32) -> (i32, i32) {
    %c0_i32 = arith.constant 0 : i32
    %c0_i32_0 = arith.constant 0 : i32
    return %c0_i32, %arg0 : i32, i32
  }
}

module attributes {stable_mosaic.version = 11 : i64} {
  func.func @_up_kernel(%arg0: i32, %arg1: memref<72x128xbf16, #tpu.memory_space<vmem>>, %arg2: memref<16x72xbf16, #tpu.memory_space<vmem>>, %arg3: memref<16x128xbf16, #tpu.memory_space<vmem>>, %arg4: memref<1x16x2xf32, #tpu.memory_space<vmem>>) attributes {dimension_semantics = [#tpu.dimension_semantics<parallel>], iteration_bounds = array<i64: 1>, scalar_prefetch = 0 : i64, scratch_operands = 0 : i64, tpu.core_type = #tpu.core_type<tc>, window_params = [{transform_indices = @transform_0, window_bounds = array<i64: 72, 128>}, {pipeline_mode = #tpu.pipeline_mode<synchronous>, transform_indices = @transform_1, window_bounds = array<i64: 16, 72>}, {transform_indices = @transform_2, window_bounds = array<i64: 16, 128>}, {transform_indices = @transform_3, window_bounds = array<i64: 1, 16, 2>}]} {
    %c0 = arith.constant 0 : index
    %c0_0 = arith.constant 0 : index
    %0 = vector.load %arg2[%c0, %c0_0] : memref<16x72xbf16, #tpu.memory_space<vmem>>, vector<16x72xbf16>
    %c0_1 = arith.constant 0 : index
    %c0_2 = arith.constant 0 : index
    %1 = vector.load %arg1[%c0_1, %c0_2] : memref<72x128xbf16, #tpu.memory_space<vmem>>, vector<72x128xbf16>
    %cst = arith.constant dense<0.000000e+00> : vector<16x128xf32>
    %2 = tpu.matmul %0, %1, %cst {dimension_numbers = #tpu.dot_dimension_numbers<[1], [0], [0], [1], [0, 0, 1, 1], [], []>} : vector<16x72xbf16>, vector<72x128xbf16>, vector<16x128xf32> -> vector<16x128xf32>
    %3 = arith.truncf %2 : vector<16x128xf32> to vector<16x128xbf16>
    %c0_3 = arith.constant 0 : index
    %c0_4 = arith.constant 0 : index
    %4 = vector.load %arg3[%c0_3, %c0_4] : memref<16x128xbf16, #tpu.memory_space<vmem>>, vector<16x128xbf16>
    tpu.vector_store %arg3[%c0_3, %c0_4], %3 {strides = array<i32>} : memref<16x128xbf16, #tpu.memory_space<vmem>>, vector<16x128xbf16>,
    %cst_5 = arith.constant dense<0.000000e+00> : vector<16xf32>
    %5 = vector.multi_reduction <add>, %2, %cst_5 [1] : vector<16x128xf32> to vector<16xf32>
    %6 = vector.shape_cast %5 : vector<16xf32> to vector<16x1xf32>
    %cst_6 = arith.constant 7.812500e-03 : f32
    %7 = vector.broadcast %cst_6 : f32 to vector<16x1xf32>
    %8 = arith.mulf %6, %7 : vector<16x1xf32>
    %9 = vector.broadcast %8 : vector<16x1xf32> to vector<16x128xf32>
    %10 = arith.subf %2, %9 : vector<16x128xf32>
    %c0_7 = arith.constant 0 : index
    %c0_8 = arith.constant 0 : index
    %c0_9 = arith.constant 0 : index
    %11 = vector.load %arg4[%c0_7, %c0_8, %c0_9] : memref<1x16x2xf32, #tpu.memory_space<vmem>>, vector<1x16x1xf32>
    %12 = vector.shape_cast %11 : vector<1x16x1xf32> to vector<16x1xf32>
    %13 = vector.shape_cast %6 : vector<16x1xf32> to vector<1x16x1xf32>
    tpu.vector_store %arg4[%c0_7, %c0_8, %c0_9], %13 {strides = array<i32>} : memref<1x16x2xf32, #tpu.memory_space<vmem>>, vector<1x16x1xf32>,
    %14 = arith.mulf %10, %10 : vector<16x128xf32>
    %cst_10 = arith.constant dense<0.000000e+00> : vector<16xf32>
    %15 = vector.multi_reduction <add>, %14, %cst_10 [1] : vector<16x128xf32> to vector<16xf32>
    %16 = vector.shape_cast %15 : vector<16xf32> to vector<16x1xf32>
    %c0_11 = arith.constant 0 : index
    %c0_12 = arith.constant 0 : index
    %c1 = arith.constant 1 : index
    %17 = vector.load %arg4[%c0_11, %c0_12, %c1] : memref<1x16x2xf32, #tpu.memory_space<vmem>>, vector<1x16x1xf32>
    %18 = vector.shape_cast %17 : vector<1x16x1xf32> to vector<16x1xf32>
    %19 = vector.shape_cast %16 : vector<16x1xf32> to vector<1x16x1xf32>
    tpu.vector_store %arg4[%c0_11, %c0_12, %c1], %19 {strides = array<i32>} : memref<1x16x2xf32, #tpu.memory_space<vmem>>, vector<1x16x1xf32>,
    return
  }
  func.func @transform_0(%arg0: i32) -> (i32, i32) {
    %c0_i32 = arith.constant 0 : i32
    %c0_i32_0 = arith.constant 0 : i32
    return %c0_i32, %arg0 : i32, i32
  }
  func.func @transform_1(%arg0: i32) -> (i32, i32) {
    %c0_i32 = arith.constant 0 : i32
    %c0_i32_0 = arith.constant 0 : i32
    %c0_i32_1 = arith.constant 0 : i32
    return %c0_i32, %c0_i32_0 : i32, i32
  }
  func.func @transform_2(%arg0: i32) -> (i32, i32) {
    %c0_i32 = arith.constant 0 : i32
    %c0_i32_0 = arith.constant 0 : i32
    return %c0_i32, %arg0 : i32, i32
  }
  func.func @transform_3(%arg0: i32) -> (i32, i32, i32) {
    %c0_i32 = arith.constant 0 : i32
    %c0_i32_0 = arith.constant 0 : i32
    %c0_i32_1 = arith.constant 0 : i32
    return %arg0, %c0_i32, %c0_i32_0 : i32, i32, i32
  }
}

module attributes {stable_mosaic.version = 11 : i64} {
  func.func @_bn_kernel(%arg0: i32, %arg1: memref<4x512xbf16, #tpu.memory_space<vmem>>, %arg2: memref<4x1xf32, #tpu.memory_space<vmem>>, %arg3: memref<4x1xf32, #tpu.memory_space<vmem>>, %arg4: memref<4x1xf32, #tpu.memory_space<vmem>>, %arg5: memref<4x1xf32, #tpu.memory_space<vmem>>, %arg6: memref<4x512xf32, #tpu.memory_space<vmem>>) attributes {dimension_semantics = [#tpu.dimension_semantics<parallel>], iteration_bounds = array<i64: 1>, scalar_prefetch = 0 : i64, scratch_operands = 0 : i64, tpu.core_type = #tpu.core_type<tc>, window_params = [{transform_indices = @transform_0, window_bounds = array<i64: 4, 512>}, {pipeline_mode = #tpu.pipeline_mode<synchronous>, transform_indices = @transform_1, window_bounds = array<i64: 4, 1>}, {pipeline_mode = #tpu.pipeline_mode<synchronous>, transform_indices = @transform_2, window_bounds = array<i64: 4, 1>}, {pipeline_mode = #tpu.pipeline_mode<synchronous>, transform_indices = @transform_3, window_bounds = array<i64: 4, 1>}, {pipeline_mode = #tpu.pipeline_mode<synchronous>, transform_indices = @transform_4, window_bounds = array<i64: 4, 1>}, {transform_indices = @transform_5, window_bounds = array<i64: 4, 512>}]} {
    %c0 = arith.constant 0 : index
    %c0_0 = arith.constant 0 : index
    %0 = vector.load %arg3[%c0, %c0_0] : memref<4x1xf32, #tpu.memory_space<vmem>>, vector<4x1xf32>
    %cst = arith.constant 9.99999974E-6 : f32
    %1 = vector.broadcast %cst : f32 to vector<4x1xf32>
    %2 = arith.addf %0, %1 : vector<4x1xf32>
    %3 = math.rsqrt %2 : vector<4x1xf32>
    %c0_1 = arith.constant 0 : index
    %c0_2 = arith.constant 0 : index
    %4 = vector.load %arg4[%c0_1, %c0_2] : memref<4x1xf32, #tpu.memory_space<vmem>>, vector<4x1xf32>
    %5 = arith.mulf %3, %4 : vector<4x1xf32>
    %c0_3 = arith.constant 0 : index
    %c0_4 = arith.constant 0 : index
    %6 = vector.load %arg1[%c0_3, %c0_4] : memref<4x512xbf16, #tpu.memory_space<vmem>>, vector<4x512xbf16>
    %7 = arith.extf %6 : vector<4x512xbf16> to vector<4x512xf32>
    %c0_5 = arith.constant 0 : index
    %c0_6 = arith.constant 0 : index
    %8 = vector.load %arg2[%c0_5, %c0_6] : memref<4x1xf32, #tpu.memory_space<vmem>>, vector<4x1xf32>
    %9 = vector.broadcast %8 : vector<4x1xf32> to vector<4x512xf32>
    %10 = arith.subf %7, %9 : vector<4x512xf32>
    %11 = vector.broadcast %5 : vector<4x1xf32> to vector<4x512xf32>
    %12 = arith.mulf %10, %11 : vector<4x512xf32>
    %c0_7 = arith.constant 0 : index
    %c0_8 = arith.constant 0 : index
    %13 = vector.load %arg5[%c0_7, %c0_8] : memref<4x1xf32, #tpu.memory_space<vmem>>, vector<4x1xf32>
    %14 = vector.broadcast %13 : vector<4x1xf32> to vector<4x512xf32>
    %15 = arith.addf %12, %14 : vector<4x512xf32>
    %c0_9 = arith.constant 0 : index
    %c0_10 = arith.constant 0 : index
    %16 = vector.load %arg6[%c0_9, %c0_10] : memref<4x512xf32, #tpu.memory_space<vmem>>, vector<4x512xf32>
    tpu.vector_store %arg6[%c0_9, %c0_10], %15 {strides = array<i32>} : memref<4x512xf32, #tpu.memory_space<vmem>>, vector<4x512xf32>,
    return
  }
  func.func @transform_0(%arg0: i32) -> (i32, i32) {
    %c0_i32 = arith.constant 0 : i32
    %c0_i32_0 = arith.constant 0 : i32
    return %c0_i32, %arg0 : i32, i32
  }
  func.func @transform_1(%arg0: i32) -> (i32, i32) {
    %c0_i32 = arith.constant 0 : i32
    %c0_i32_0 = arith.constant 0 : i32
    %c0_i32_1 = arith.constant 0 : i32
    return %c0_i32, %c0_i32_0 : i32, i32
  }
  func.func @transform_2(%arg0: i32) -> (i32, i32) {
    %c0_i32 = arith.constant 0 : i32
    %c0_i32_0 = arith.constant 0 : i32
    %c0_i32_1 = arith.constant 0 : i32
    return %c0_i32, %c0_i32_0 : i32, i32
  }
  func.func @transform_3(%arg0: i32) -> (i32, i32) {
    %c0_i32 = arith.constant 0 : i32
    %c0_i32_0 = arith.constant 0 : i32
    %c0_i32_1 = arith.constant 0 : i32
    return %c0_i32, %c0_i32_0 : i32, i32
  }
  func.func @transform_4(%arg0: i32) -> (i32, i32) {
    %c0_i32 = arith.constant 0 : i32
    %c0_i32_0 = arith.constant 0 : i32
    %c0_i32_1 = arith.constant 0 : i32
    return %c0_i32, %c0_i32_0 : i32, i32
  }
  func.func @transform_5(%arg0: i32) -> (i32, i32) {
    %c0_i32 = arith.constant 0 : i32
    %c0_i32_0 = arith.constant 0 : i32
    return %c0_i32, %arg0 : i32, i32
  }
}

</mosaic_0001>

<bundles_post_ra>
// kernel: unet_innermost_block.3
= control target key start
LH: loop header
LB: loop body
LE: loop exit
PB: predicated region body
PF: predicated region fallthrough
CT: control target
= control target key end

     0   :  { %7 = vsyncpa [#allocation3], 0  ;;  %s321_s0 = inlined_call_operand.hbm [shape: bf16[64,128], index: 0, kind: input, shape index: {}]   ;;  %s322_s1 = inlined_call_operand.hbm [shape: bf16[8,64], index: 1, kind: input, shape index: {}]   ;;  %s323_s2 = inlined_call_operand.hbm [shape: bf16[8,128], index: 2, kind: output, shape index: {}]  }
   0x1   :  { %8 = vsyncpa [#allocation6], 0 }
   0x2   :  { %9 = vsyncpa [#allocation4], 0  ;;  %s263_s9 = smov [#allocation2]   ;;  %s191_s13 = scalar_lea.hbm %s321_s0, 512 }
   0x3   :  { %s15_s10 = sshll.u32 %s263_s9, 4  ;;  %p192_p0 = scmp.ne.s32.totalorder %s321_s0, %s191_s13  ;;  %s16_s10 = int_to_ptr.vmem [resolvable:$true] %s15_s10 }
   0x4   :  { %p195_p1 = scmp.lt.u32.totalorder %s191_s13, %s321_s0 }
   0x6   :  { %p197_p2 = pnand %p195_p1, %p192_p0 }
   0x8   :  { %200 = shalt.err (!%p197_p2)
}
   0x9   :  { %s201_s18 = scalar_lea.vmem %s16_s10, 512  ;;  %p206_p4 = scmp.lt.s32.totalorder %s16_s10, %s16_s10 }
   0xa   :  { %p202_p3 = scmp.ne.s32.totalorder %s16_s10, %s201_s18  ;;  %p207_p5 = scmp.lt.s32.totalorder %s201_s18, %s201_s18 }
   0xc   :  { %p208_p6 = por %p207_p5, %p206_p4 }
   0xe   :  { %p209_p7 = pnand %p208_p6, %p202_p3 }
  0x10   :  { %212 = shalt.err (!%p209_p7)
}
  0x11   :  { %s264_s19 = smov 64   ;;  %s265_s20 = smov 4  }
  0x12   :  { %21 = dma.hbm_to_vmem [thread:$0]  %s321_s0, 512, %s16_s10, [#allocation3], %s264_s19, %s264_s19, %s265_s20  }
  0x13   :  { %s266_s23 = smov [#allocation5]   ;;  %s213_s27 = scalar_lea.hbm %s322_s1, 64 }
  0x14   :  { %s28_s24 = sshll.u32 %s266_s23, 4  ;;  %p214_p8 = scmp.ne.s32.totalorder %s322_s1, %s213_s27  ;;  %s29_s24 = int_to_ptr.vmem [resolvable:$true] %s28_s24 }
  0x15   :  { %p217_p9 = scmp.lt.u32.totalorder %s213_s27, %s322_s1 }
  0x17   :  { %p219_p10 = pnand %p217_p9, %p214_p8 }
  0x19   :  { %222 = shalt.err (!%p219_p10)
}
  0x1a   :  { %s223_s4 = scalar_lea.vmem %s29_s24, 64  ;;  %p228_p12 = scmp.lt.s32.totalorder %s29_s24, %s29_s24 }
  0x1b   :  { %p224_p11 = scmp.ne.s32.totalorder %s29_s24, %s223_s4  ;;  %p229_p13 = scmp.lt.s32.totalorder %s223_s4, %s223_s4 }
  0x1d   :  { %p230_p0 = por %p229_p13, %p228_p12 }
  0x1f   :  { %p231_p1 = pnand %p230_p0, %p224_p11 }
  0x21   :  { %234 = shalt.err (!%p231_p1)
}
  0x22   :  { %31 = dma.hbm_to_vmem [thread:$0]  %s322_s1, 64, %s29_s24, [#allocation6]  }
  0x23   :  { %257 = dma.done.wait [#allocation3], 512  }
  0x24   :  { %258 = vsyncadd [#allocation3], 4294966784 }
  0x25   :  { %259 = dma.done.wait [#allocation6], 64  }
  0x26   :  { %260 = vsyncadd [#allocation6], 4294967232  ;;  %v267_v0 = vmov 0.0   ;;  %vm268_vm0 = vmmov 0   ;;  %v149_v1 = vld [vmem:[#allocation2] sm:$0xff]   ;;  %v164_v2 = vld [vmem:[#allocation2 + $0x8] sm:$0xff]  }
  0x27   :  { %172 = vmatprep.subr.bf16.mxu0 %v267_v0  ;;  %180 = vmatprep.mubr.msk.bf16.mxu0 %vm268_vm0, %v267_v0  ;;  %v165_v3 = vld [vmem:[#allocation2 + $0x10] sm:$0xff]   ;;  %v150_v4 = vunpack.c.l.bf16 %v149_v1  ;;  %v151_v5 = vunpack.c.h.bf16 %v149_v1  ;;  %v154_v6 = vunpack.c.l.bf16 %v164_v2  ;;  %v155_v7 = vunpack.c.h.bf16 %v164_v2  ;;  %v166_v8 = vld [vmem:[#allocation2 + $0x18] sm:$0xff]   ;;  %v79_v33 = vld [vmem:[#allocation5] sm:$0xf]  ;;  %s269_s1 = smov [#allocation7]  }
  0x28   :  { %v158_v9 = vunpack.c.l.bf16 %v165_v3  ;;  %v159_v10 = vunpack.c.h.bf16 %v165_v3  ;;  %v162_v11 = vunpack.c.l.bf16 %v166_v8  ;;  %v163_v12 = vunpack.c.h.bf16 %v166_v8  ;;  %s137_s6 = sshll.u32 %s269_s1, 4  ;;  %s138_s6 = int_to_ptr.vmem [resolvable:$true] %s137_s6 }
  0x29   :  { %vm55_vm1 = vcmp.ge.f32.partialorder %v150_v4, 0.0  ;;  %vm56_vm2 = vcmp.ge.f32.partialorder %v151_v5, 0.0  ;;  %v63_v13 = vmul.f32 0.2, %v150_v4  ;;  %v64_v14 = vmul.f32 0.2, %v151_v5  ;;  %p240_p3 = scmp.lt.s32.totalorder %s138_s6, %s138_s6 }
  0x2a   :  { %vm57_vm3 = vcmp.ge.f32.partialorder %v154_v6, 0.0  ;;  %vm58_vm4 = vcmp.ge.f32.partialorder %v155_v7, 0.0  ;;  %v65_v15 = vmul.f32 0.2, %v154_v6  ;;  %v66_v16 = vmul.f32 0.2, %v155_v7 }
  0x2b   :  { %v71_v17 = vsel %vm55_vm1, %v150_v4, %v63_v13  ;;  %v72_v18 = vsel %vm56_vm2, %v151_v5, %v64_v14  ;;  %vm59_vm5 = vcmp.ge.f32.partialorder %v158_v9, 0.0  ;;  %vm60_vm6 = vcmp.ge.f32.partialorder %v159_v10, 0.0  ;;  %s235_s7 = scalar_lea.vmem %s138_s6, 64 }
  0x2c   :  { %v80_v19 = vpack.c.bf16 %v72_v18, %v71_v17  ;;  %v73_v20 = vsel %vm57_vm3, %v154_v6, %v65_v15  ;;  %v74_v21 = vsel %vm58_vm4, %v155_v7, %v66_v16  ;;  %v67_v22 = vmul.f32 0.2, %v158_v9  ;;  %p236_p2 = scmp.ne.s32.totalorder %s138_s6, %s235_s7  ;;  %p241_p4 = scmp.lt.s32.totalorder %s235_s7, %s235_s7 }
  0x2d   :  { %v68_v23 = vmul.f32 0.2, %v159_v10  ;;  %v81_v24 = vpack.c.bf16 %v74_v21, %v73_v20  ;;  %v69_v27 = vmul.f32 0.2, %v162_v11  ;;  %v70_v28 = vmul.f32 0.2, %v163_v12 }
  0x2e   :  { %173 = vmatpush3.bf16.msra.mxu0 %v80_v19  ;;  %v75_v25 = vsel %vm59_vm5, %v158_v9, %v67_v22  ;;  %vm61_vm7 = vcmp.ge.f32.partialorder %v162_v11, 0.0  ;;  %vm62_vm8 = vcmp.ge.f32.partialorder %v163_v12, 0.0  ;;  %vm84_vm9 = vcmask 523264   ;;  %p242_p5 = por %p241_p4, %p240_p3 }
  0x2f   :  { %174 = vmatprep.subr.bf16.mxu0 %v267_v0  ;;  %v76_v26 = vsel %vm60_vm6, %v159_v10, %v68_v23  ;;  %v77_v30 = vsel %vm61_vm7, %v162_v11, %v69_v27  ;;  %v78_v31 = vsel %vm62_vm8, %v163_v12, %v70_v28 }
  0x30   :  { %v82_v29 = vpack.c.bf16 %v76_v26, %v75_v25  ;;  %v83_v32 = vpack.c.bf16 %v78_v31, %v77_v30  ;;  %p243_p6 = pnand %p242_p5, %p236_p2 }
  0x32   :  { %175 = vmatpush3.bf16.msra.mxu0 %v81_v24 }
  0x33   :  { %176 = vmatprep.subr.bf16.mxu0 %v267_v0 }
  0x36   :  { %177 = vmatpush3.bf16.msra.mxu0 %v82_v29 }
  0x37   :  { %178 = vmatprep.subr.bf16.mxu0 %v267_v0 }
  0x3a   :  { %179 = vmatpush3.bf16.msra.mxu0 %v83_v32 }
  0x3d   :  { %181 = vmatmul.mubr.msk.bf16.vlgmr.msra.gmra.mrb[0].mxu0 %vm84_vm9, %v79_v33 }
 0x110   :  { %v122_v34 = vpop.f32.mrb[0].mxu0 }
 0x111   :  { %v128_v35 = vmax.f32 %v122_v34, 0.0  ;;  %v182_v36 = vpop.f32.mrb[1].mxu0 }
 0x112   :  { %v125_v37 = vpop.f32.mrb[2].mxu0 }
 0x113   :  { %v129_v38 = vpack.c.bf16 %v128_v35, %v128_v35  ;;  %v183_v39 = vpop.f32.mrb[3].mxu0 }
 0x115   :  { %130 = vst [vmem:[#allocation7] sm:$0xf] %v129_v38 }
 0x116   :  { %246 = shalt.err (!%p243_p6)
}
 0x117   :  { %s247_s10 = scalar_lea.hbm %s323_s2, 64 }
 0x118   :  { %p248_p7 = scmp.ne.s32.totalorder %s323_s2, %s247_s10  ;;  %p251_p8 = scmp.lt.u32.totalorder %s247_s10, %s323_s2 }
 0x11a   :  { %p253_p9 = pnand %p251_p8, %p248_p7 }
 0x11c   :  { %256 = shalt.err (!%p253_p9)
}
 0x11d   :  { %140 = dma.vmem_to_hbm [thread:$0]  %s138_s6, 64, %s323_s2, [#allocation4]  }
 0x11e   :  { %261 = dma.done.wait [#allocation4], 64  }
 0x11f   :  { %262 = vsyncadd [#allocation4], 4294967232 }
 0x120   :  { %144 = vsyncpa [#allocation3], 1 }
 0x121   :  { %145 = vsyncpa [#allocation6], 1 }
 0x122   :  { %146 = vsyncpa [#allocation4], 1 }

// kernel: unet_innermost_block.4
= control target key start
LH: loop header
LB: loop body
LE: loop exit
PB: predicated region body
PF: predicated region fallthrough
CT: control target
= control target key end

     0   :  { %9 = vsyncpa [#allocation3], 0  ;;  %s435_s0 = inlined_call_operand.hbm [shape: bf16[72,128], index: 0, kind: input, shape index: {}]   ;;  %s436_s1 = inlined_call_operand.hbm [shape: bf16[16,72], index: 1, kind: input, shape index: {}]   ;;  %s437_s2 = inlined_call_operand.hbm [shape: bf16[16,128], index: 2, kind: output, shape index: {0}]   ;;  %s438_s3 = inlined_call_operand.hbm [shape: f32[1,16,2], index: 3, kind: output, shape index: {1}]  }
   0x1   :  { %10 = vsyncpa [#allocation6], 0 }
   0x2   :  { %11 = vsyncpa [#allocation4], 0 }
   0x3   :  { %12 = vsyncpa [#allocation9], 0  ;;  %s348_s12 = smov [#allocation2]   ;;  %s252_s16 = scalar_lea.hbm %s435_s0, 576 }
   0x4   :  { %s18_s13 = sshll.u32 %s348_s12, 4  ;;  %p253_p0 = scmp.ne.s32.totalorder %s435_s0, %s252_s16  ;;  %s19_s13 = int_to_ptr.vmem [resolvable:$true] %s18_s13 }
   0x5   :  { %p256_p1 = scmp.lt.u32.totalorder %s252_s16, %s435_s0 }
   0x7   :  { %p258_p2 = pnand %p256_p1, %p253_p0 }
   0x9   :  { %261 = shalt.err (!%p258_p2)
}
   0xa   :  { %s262_s21 = scalar_lea.vmem %s19_s13, 576  ;;  %p267_p4 = scmp.lt.s32.totalorder %s19_s13, %s19_s13 }
   0xb   :  { %p263_p3 = scmp.ne.s32.totalorder %s19_s13, %s262_s21  ;;  %p268_p5 = scmp.lt.s32.totalorder %s262_s21, %s262_s21 }
   0xd   :  { %p269_p6 = por %p268_p5, %p267_p4 }
   0xf   :  { %p270_p7 = pnand %p269_p6, %p263_p3 }
  0x11   :  { %273 = shalt.err (!%p270_p7)
}
  0x12   :  { %s349_s22 = smov 64   ;;  %s350_s23 = smov 4  }
  0x13   :  { %24 = dma.hbm_to_vmem [thread:$0]  %s435_s0, 576, %s19_s13, [#allocation3], %s349_s22, %s349_s22, %s350_s23  }
  0x14   :  { %s351_s26 = smov [#allocation5]   ;;  %s274_s30 = scalar_lea.hbm %s436_s1, 128 }
  0x15   :  { %s30_s27 = sshll.u32 %s351_s26, 4  ;;  %p275_p8 = scmp.ne.s32.totalorder %s436_s1, %s274_s30  ;;  %s31_s27 = int_to_ptr.vmem [resolvable:$true] %s30_s27 }
  0x16   :  { %p278_p9 = scmp.lt.u32.totalorder %s274_s30, %s436_s1 }
  0x18   :  { %p280_p10 = pnand %p278_p9, %p275_p8 }
  0x1a   :  { %283 = shalt.err (!%p280_p10)
}
  0x1b   :  { %s284_s8 = scalar_lea.vmem %s31_s27, 128  ;;  %p289_p12 = scmp.lt.s32.totalorder %s31_s27, %s31_s27 }
  0x1c   :  { %p285_p11 = scmp.ne.s32.totalorder %s31_s27, %s284_s8  ;;  %p290_p13 = scmp.lt.s32.totalorder %s284_s8, %s284_s8 }
  0x1e   :  { %p291_p0 = por %p290_p13, %p289_p12 }
  0x20   :  { %p292_p1 = pnand %p291_p0, %p285_p11 }
  0x22   :  { %295 = shalt.err (!%p292_p1)
}
  0x23   :  { %36 = dma.hbm_to_vmem [thread:$0]  %s436_s1, 128, %s31_s27, [#allocation6], %s349_s22, %s349_s22, %s350_s23  }
  0x24   :  { %340 = dma.done.wait [#allocation3], 576  }
  0x25   :  { %341 = vsyncadd [#allocation3], 4294966720 }
  0x26   :  { %342 = dma.done.wait [#allocation6], 128  }
  0x27   :  { %343 = vsyncadd [#allocation6], 4294967168  ;;  %v352_v0 = vmov 0.0   ;;  %vm353_vm0 = vmmov 0   ;;  %v246_v1 = vld [vmem:[#allocation2] sm:$0xff]   ;;  %v247_v2 = vld [vmem:[#allocation2 + $0x8] sm:$0xff]  }
  0x28   :  { %222 = vmatprep.subr.bf16.mxu0 %v352_v0  ;;  %232 = vmatprep.mubr.msk.bf16.mxu0 %vm353_vm0, %v352_v0  ;;  %v248_v3 = vld [vmem:[#allocation2 + $0x10] sm:$0xff]   ;;  %v249_v4 = vld [vmem:[#allocation2 + $0x18] sm:$0xff]   ;;  %v250_v5 = vld [vmem:[#allocation2 + $0x20] ss:$0 sps:$4 sm:$0xff]   ;;  %vm91_vm1 = vcmask 1043456   ;;  %vm87_vm2 = vcmask 588800  }
  0x29   :  { %223 = vmatpush3.bf16.msra.mxu0 %v246_v1  ;;  %v93_v6 = vsel %vm91_vm1, %v250_v5, 0  ;;  %v251_v7 = vld [vmem:[#allocation5] sm:$0xff]   ;;  %vm154_vm3 = vcmask 7168   ;;  %s354_s1 = smov [#allocation7]  }
  0x2a   :  { %224 = vmatprep.subr.bf16.mxu0 %v352_v0  ;;  %s171_s10 = sshll.u32 %s354_s1, 4  ;;  %s172_s10 = int_to_ptr.vmem [resolvable:$true] %s171_s10 }
  0x2b   :  { %s296_s11 = scalar_lea.vmem %s172_s10, 128  ;;  %p301_p3 = scmp.lt.s32.totalorder %s172_s10, %s172_s10 }
  0x2c   :  { %p297_p2 = scmp.ne.s32.totalorder %s172_s10, %s296_s11  ;;  %p302_p4 = scmp.lt.s32.totalorder %s296_s11, %s296_s11 }
  0x2d   :  { %225 = vmatpush3.bf16.msra.mxu0 %v247_v2 }
  0x2e   :  { %226 = vmatprep.subr.bf16.mxu0 %v352_v0  ;;  %p303_p5 = por %p302_p4, %p301_p3 }
  0x30   :  { %p304_p6 = pnand %p303_p5, %p297_p2 }
  0x31   :  { %227 = vmatpush3.bf16.msra.mxu0 %v248_v3 }
  0x32   :  { %228 = vmatprep.subr.bf16.mxu0 %v352_v0 }
  0x35   :  { %229 = vmatpush3.bf16.msra.mxu0 %v249_v4 }
  0x36   :  { %230 = vmatprep.subr.bf16.mxu0 %v352_v0 }
  0x39   :  { %231 = vmatpush3.bf16.msra.mxu0 %v93_v6 }
  0x3c   :  { %233 = vmatmul.mubr.msk.bf16.vlgmr.msra.gmra.mrb[0].mxu0 %vm87_vm2, %v251_v7 }
 0x10f   :  { %v129_v8 = vpop.f32.mrb[0].mxu0 }
 0x110   :  { %146 = vadd.xlane.f32.xlu0 %v129_v8  ;;  %v234_v9 = vpop.f32.mrb[1].mxu0 }
 0x111   :  { %v132_v10 = vpop.f32.mrb[2].mxu0 }
 0x112   :  { %v214_v11 = vpack.c.bf16 %v132_v10, %v129_v8  ;;  %v235_v12 = vpop.f32.mrb[3].mxu0 }
 0x114   :  { %215 = vst [vmem:[#allocation7] sm:$0xff] %v214_v11   ;;  %148 = vadd.xlane.f32.xlu0 %v132_v10 }
 0x19d   :  { %v147_v13 = vpop.xlane.xlu0 %146 }
 0x19e   :  { %v150_v14 = vmul.f32 0.0078125, %v147_v13  ;;  %155 = vst.msk [vmem:[#allocation8] sm:$0xff] %vm154_vm3, %v147_v13 }
 0x1a0   :  { %v152_v15 = vsub.f32 %v129_v8, %v150_v14 }
 0x1a1   :  { %v149_v16 = vpop.xlane.xlu0 %148 }
 0x1a2   :  { %v151_v17 = vmul.f32 0.0078125, %v149_v16  ;;  %156 = vst.msk [vmem:[#allocation8 + $0x8] sm:$0xff] %vm154_vm3, %v149_v16  ;;  %v157_v18 = vmul.f32 %v152_v15, %v152_v15 }
 0x1a4   :  { %159 = vadd.xlane.f32.xlu1 %v157_v18  ;;  %v153_v19 = vsub.f32 %v132_v10, %v151_v17 }
 0x1a6   :  { %v158_v20 = vmul.f32 %v153_v19, %v153_v19 }
 0x1a8   :  { %161 = vadd.xlane.f32.xlu1 %v158_v20 }
 0x1a9   :  { %307 = shalt.err (!%p304_p6)
}
 0x1aa   :  { %s308_s14 = scalar_lea.hbm %s437_s2, 128 }
 0x1ab   :  { %p309_p7 = scmp.ne.s32.totalorder %s437_s2, %s308_s14  ;;  %p312_p8 = scmp.lt.u32.totalorder %s308_s14, %s437_s2 }
 0x1ad   :  { %p314_p9 = pnand %p312_p8, %p309_p7 }
 0x1af   :  { %317 = shalt.err (!%p314_p9)
}
 0x1b0   :  { %177 = dma.vmem_to_hbm [thread:$0]  %s172_s10, 128, %s437_s2, [#allocation4], %s349_s22, %s349_s22, %s350_s23   ;;  %vm163_vm4 = vcmask 15368  }
 0x1b1   :  { %s355_s21 = smov [#allocation8]  }
 0x1b2   :  { %s183_s24 = sshll.u32 %s355_s21, 4  ;;  %s184_s24 = int_to_ptr.vmem [resolvable:$true] %s183_s24 }
 0x1b3   :  { %s318_s25 = scalar_lea.vmem %s184_s24, 256  ;;  %p323_p11 = scmp.lt.s32.totalorder %s184_s24, %s184_s24 }
 0x1b4   :  { %p319_p10 = scmp.ne.s32.totalorder %s184_s24, %s318_s25  ;;  %p324_p12 = scmp.lt.s32.totalorder %s318_s25, %s318_s25 }
 0x1b6   :  { %p325_p13 = por %p324_p12, %p323_p11 }
 0x1b8   :  { %p326_p0 = pnand %p325_p13, %p319_p10 }
 0x231   :  { %v160_v21 = vpop.xlane.xlu1 %159 }
 0x232   :  { %164 = vst.msk [vmem:[#allocation8] sm:$0xff] %vm163_vm4, %v160_v21 }
 0x235   :  { %v162_v22 = vpop.xlane.xlu1 %161 }
 0x236   :  { %165 = vst.msk [vmem:[#allocation8 + $0x8] sm:$0xff] %vm163_vm4, %v162_v22 }
 0x237   :  { %329 = shalt.err (!%p326_p0)
}
 0x238   :  { %s330_s28 = scalar_lea.hbm %s438_s3, 256 }
 0x239   :  { %p331_p1 = scmp.ne.s32.totalorder %s438_s3, %s330_s28  ;;  %p334_p2 = scmp.lt.u32.totalorder %s330_s28, %s438_s3 }
 0x23b   :  { %p336_p3 = pnand %p334_p2, %p331_p1 }
 0x23d   :  { %339 = shalt.err (!%p336_p3)
}
 0x23e   :  { %s356_s30 = smov 128   ;;  %s357_s4 = smov 8  }
 0x23f   :  { %189 = dma.vmem_to_hbm [thread:$0]  %s184_s24, 256, %s438_s3, [#allocation9], %s356_s30, %s356_s30, %s357_s4  }
 0x240   :  { %344 = dma.done.wait [#allocation4], 128  }
 0x241   :  { %345 = vsyncadd [#allocation4], 4294967168 }
 0x242   :  { %346 = dma.done.wait [#allocation9], 256  }
 0x243   :  { %347 = vsyncadd [#allocation9], 4294967040 }
 0x244   :  { %196 = vsyncpa [#allocation3], 1 }
 0x245   :  { %197 = vsyncpa [#allocation6], 1 }
 0x246   :  { %198 = vsyncpa [#allocation4], 1 }
 0x247   :  { %199 = vsyncpa [#allocation9], 1 }

// kernel: unet_innermost_block.5
= control target key start
LH: loop header
LB: loop body
LE: loop exit
PB: predicated region body
PF: predicated region fallthrough
CT: control target
= control target key end

     0   :  { %10 = vsyncpa [#allocation3], 0  ;;  %s412_s0 = inlined_call_operand.hbm [shape: bf16[4,512], index: 0, kind: input, shape index: {}]   ;;  %s413_s1 = inlined_call_operand.hbm [shape: f32[4,1], index: 1, kind: input, shape index: {}]   ;;  %s414_s2 = inlined_call_operand.hbm [shape: f32[4,1], index: 2, kind: input, shape index: {}]   ;;  %s415_s3 = inlined_call_operand.hbm [shape: f32[4,1], index: 3, kind: input, shape index: {}]   ;;  %s416_s4 = inlined_call_operand.hbm [shape: f32[4,1], index: 4, kind: input, shape index: {}]   ;;  %s417_s5 = inlined_call_operand.hbm [shape: f32[4,512], index: 5, kind: output, shape index: {}]  }
   0x1   :  { %11 = vsyncpa [#allocation6], 0 }
   0x2   :  { %12 = vsyncpa [#allocation9], 0 }
   0x3   :  { %13 = vsyncpa [#allocation4], 0  ;;  %s302_s18 = smov [#allocation5]   ;;  %s303_s20 = smov [#allocation8]  }
   0x4   :  { %s30_s19 = sshll.u32 %s302_s18, 4  ;;  %s50_s21 = sshll.u32 %s303_s20, 4  ;;  %s31_s19 = int_to_ptr.vmem [resolvable:$true] %s30_s19  ;;  %s51_s21 = int_to_ptr.vmem [resolvable:$true] %s50_s21 }
   0x5   :  { %s162_s24 = scalar_lea.hbm %s413_s1, 64 }
   0x6   :  { %p163_p0 = scmp.ne.s32.totalorder %s413_s1, %s162_s24  ;;  %p166_p1 = scmp.lt.u32.totalorder %s162_s24, %s413_s1 }
   0x8   :  { %p168_p2 = pnand %p166_p1, %p163_p0 }
   0xa   :  { %171 = shalt.err (!%p168_p2)
}
   0xb   :  { %s172_s29 = scalar_lea.vmem %s31_s19, 64  ;;  %p177_p4 = scmp.lt.s32.totalorder %s31_s19, %s31_s19 }
   0xc   :  { %p173_p3 = scmp.ne.s32.totalorder %s31_s19, %s172_s29  ;;  %p178_p5 = scmp.lt.s32.totalorder %s172_s29, %s172_s29 }
   0xe   :  { %p179_p6 = por %p178_p5, %p177_p4 }
  0x10   :  { %p180_p7 = pnand %p179_p6, %p173_p3 }
  0x12   :  { %183 = shalt.err (!%p180_p7)
}
  0x13   :  { %33 = dma.hbm_to_vmem [thread:$0]  %s413_s1, 64, %s31_s19, [#allocation6]  }
  0x14   :  { %s184_s9 = scalar_lea.hbm %s415_s3, 64 }
  0x15   :  { %p185_p8 = scmp.ne.s32.totalorder %s415_s3, %s184_s9  ;;  %p188_p9 = scmp.lt.u32.totalorder %s184_s9, %s415_s3 }
  0x17   :  { %p190_p10 = pnand %p188_p9, %p185_p8 }
  0x19   :  { %193 = shalt.err (!%p190_p10)
}
  0x1a   :  { %s194_s14 = scalar_lea.vmem %s51_s21, 64  ;;  %p199_p12 = scmp.lt.s32.totalorder %s51_s21, %s51_s21 }
  0x1b   :  { %p195_p11 = scmp.ne.s32.totalorder %s51_s21, %s194_s14  ;;  %p200_p13 = scmp.lt.s32.totalorder %s194_s14, %s194_s14 }
  0x1d   :  { %p201_p0 = por %p200_p13, %p199_p12 }
  0x1f   :  { %p202_p1 = pnand %p201_p0, %p195_p11 }
  0x21   :  { %205 = shalt.err (!%p202_p1)
}
  0x22   :  { %53 = dma.hbm_to_vmem [thread:$0]  %s415_s3, 64, %s51_s21, [#allocation9]  }
  0x23   :  { %s304_s16 = smov [#allocation2]   ;;  %s305_s18 = smov [#allocation7]  }
  0x24   :  { %s20_s17 = sshll.u32 %s304_s16, 4  ;;  %s40_s19 = sshll.u32 %s305_s18, 4  ;;  %s21_s17 = int_to_ptr.vmem [resolvable:$true] %s20_s17  ;;  %s41_s19 = int_to_ptr.vmem [resolvable:$true] %s40_s19 }
  0x25   :  { %s206_s23 = scalar_lea.hbm %s412_s0, 128 }
  0x26   :  { %p207_p2 = scmp.ne.s32.totalorder %s412_s0, %s206_s23  ;;  %p210_p3 = scmp.lt.u32.totalorder %s206_s23, %s412_s0 }
  0x28   :  { %p212_p4 = pnand %p210_p3, %p207_p2 }
  0x2a   :  { %215 = shalt.err (!%p212_p4)
}
  0x2b   :  { %s216_s3 = scalar_lea.vmem %s21_s17, 128  ;;  %p221_p6 = scmp.lt.s32.totalorder %s21_s17, %s21_s17 }
  0x2c   :  { %p217_p5 = scmp.ne.s32.totalorder %s21_s17, %s216_s3  ;;  %p222_p7 = scmp.lt.s32.totalorder %s216_s3, %s216_s3 }
  0x2e   :  { %p223_p8 = por %p222_p7, %p221_p6 }
  0x30   :  { %p224_p9 = pnand %p223_p8, %p217_p5 }
  0x32   :  { %227 = shalt.err (!%p224_p9)
}
  0x33   :  { %23 = dma.hbm_to_vmem [thread:$0]  %s412_s0, 128, %s21_s17, [#allocation3]  }
  0x34   :  { %s228_s6 = scalar_lea.hbm %s414_s2, 64 }
  0x35   :  { %p229_p10 = scmp.ne.s32.totalorder %s414_s2, %s228_s6  ;;  %p232_p11 = scmp.lt.u32.totalorder %s228_s6, %s414_s2 }
  0x37   :  { %p234_p12 = pnand %p232_p11, %p229_p10 }
  0x39   :  { %237 = shalt.err (!%p234_p12)
}
  0x3a   :  { %s238_s11 = scalar_lea.vmem %s41_s19, 64  ;;  %p243_p0 = scmp.lt.s32.totalorder %s41_s19, %s41_s19 }
  0x3b   :  { %p239_p13 = scmp.ne.s32.totalorder %s41_s19, %s238_s11  ;;  %p244_p1 = scmp.lt.s32.totalorder %s238_s11, %s238_s11 }
  0x3d   :  { %p245_p2 = por %p244_p1, %p243_p0 }
  0x3f   :  { %p246_p3 = pnand %p245_p2, %p239_p13 }
  0x41   :  { %249 = shalt.err (!%p246_p3)
}
  0x42   :  { %43 = dma.hbm_to_vmem [thread:$0]  %s414_s2, 64, %s41_s19, [#allocation6]  }
  0x43   :  { %s306_s13 = smov [#allocation10]   ;;  %s250_s16 = scalar_lea.hbm %s416_s4, 64 }
  0x44   :  { %s60_s14 = sshll.u32 %s306_s13, 4  ;;  %p251_p4 = scmp.ne.s32.totalorder %s416_s4, %s250_s16  ;;  %s61_s14 = int_to_ptr.vmem [resolvable:$true] %s60_s14 }
  0x45   :  { %p254_p5 = scmp.lt.u32.totalorder %s250_s16, %s416_s4 }
  0x47   :  { %p256_p6 = pnand %p254_p5, %p251_p4 }
  0x49   :  { %259 = shalt.err (!%p256_p6)
}
  0x4a   :  { %s260_s23 = scalar_lea.vmem %s61_s14, 64  ;;  %p265_p8 = scmp.lt.s32.totalorder %s61_s14, %s61_s14 }
  0x4b   :  { %p261_p7 = scmp.ne.s32.totalorder %s61_s14, %s260_s23  ;;  %p266_p9 = scmp.lt.s32.totalorder %s260_s23, %s260_s23 }
  0x4d   :  { %p267_p10 = por %p266_p9, %p265_p8 }
  0x4f   :  { %p268_p11 = pnand %p267_p10, %p261_p7 }
  0x51   :  { %271 = shalt.err (!%p268_p11)
}
  0x52   :  { %63 = dma.hbm_to_vmem [thread:$0]  %s416_s4, 64, %s61_s14, [#allocation9]  }
  0x53   :  { %294 = dma.done.wait [#allocation3], 128  }
  0x54   :  { %295 = vsyncadd [#allocation3], 4294967168 }
  0x55   :  { %296 = dma.done.wait [#allocation6], 128  }
  0x56   :  { %297 = vsyncadd [#allocation6], 4294967168 }
  0x57   :  { %298 = dma.done.wait [#allocation9], 128  }
  0x58   :  { %299 = vsyncadd [#allocation9], 4294967168  ;;  %v307_v0 = vmov 0   ;;  %v87_v1 = vld [vmem:[#allocation5] sm:$0xf]  ;;  %v95_v10 = vlaneseq  ;;  %v84_v15 = vld [vmem:[#allocation2] sm:$0xff] }
  0x59   :  { %158 = vset.pattern.permute.xlu0 %v307_v0  ;;  %159 = vset.pattern.permute.xlu1 %v307_v0  ;;  %v79_v2 = vld [vmem:[#allocation7] sm:$0xf]  ;;  %v116_v4 = vld [vmem:[#allocation10] sm:$0xf]  ;;  %v82_v5 = vld [vmem:[#allocation8] sm:$0xf]  ;;  %v85_v16 = vunpack.c.l.bf16 %v84_v15  ;;  %v86_v17 = vunpack.c.h.bf16 %v84_v15 }
  0x5a   :  { %90 = vperm.xlu0 %158, %v87_v1   ;;  %v80_v3 = vadd.f32 1e-05, %v79_v2  ;;  %119 = vperm.xlu1 %159, %v116_v4   ;;  %v308_v8 = vmov 839922192   ;;  %v96_v12 = vshrl.u32 %v95_v10, 7  ;;  %s309_s4 = smov [#allocation11]  }
  0x5b   :  { %v93_v9 = vunpack.c.l.s4 %v308_v8  ;;  %s139_s24 = sshll.u32 %s309_s4, 4  ;;  %s140_s24 = int_to_ptr.vmem [resolvable:$true] %s139_s24 }
  0x5c   :  { %160 = vrsqrt.f32 %v80_v3  ;;  %s272_s25 = scalar_lea.vmem %s140_s24, 256  ;;  %p277_p13 = scmp.lt.s32.totalorder %s140_s24, %s140_s24 }
  0x5d   :  { %v94_v11 = vunpack.c.0.s8 %v93_v9  ;;  %p273_p12 = scmp.ne.s32.totalorder %s140_s24, %s272_s25  ;;  %p278_p0 = scmp.lt.s32.totalorder %s272_s25, %s272_s25 }
  0x5f   :  { %v97_v13 = vsub.s32 %v94_v11, %v96_v12  ;;  %p279_p1 = por %p278_p0, %p277_p13 }
  0x61   :  { %p280_p2 = pnand %p279_p1, %p273_p12 }
  0x66   :  { %v161_v6 = vpop.eup %160 }
  0x67   :  { %v83_v7 = vmul.f32 %v161_v6, %v82_v5 }
  0x69   :  { %104 = vperm.xlu0 %158, %v83_v7  }
  0xd9   :  { %v91_v14 = vpop.permute.xlu0 %90  ;;  %v120_v19 = vpop.permute.xlu1 %119 }
  0xda   :  { %v98_v18 = vrot.slane %v91_v14, %v97_v13  ;;  %v127_v24 = vrot.slane %v120_v19, %v97_v13 }
  0xdc   :  { %v100_v21 = vsub.f32 %v85_v16, %v98_v18  ;;  %v101_v22 = vsub.f32 %v86_v17, %v98_v18 }
  0xe8   :  { %v105_v20 = vpop.permute.xlu0 %104 }
  0xe9   :  { %v112_v23 = vrot.slane %v105_v20, %v97_v13 }
  0xeb   :  { %v114_v25 = vmul.f32 %v112_v23, %v100_v21  ;;  %v115_v26 = vmul.f32 %v112_v23, %v101_v22 }
  0xed   :  { %v129_v27 = vadd.f32 %v127_v24, %v114_v25  ;;  %v130_v28 = vadd.f32 %v127_v24, %v115_v26 }
  0xef   :  { %131 = vst [vmem:[#allocation11] sm:$0xff] %v129_v27  ;;  %132 = vst [vmem:[#allocation11 + $0x8] sm:$0xff] %v130_v28 }
  0xf0   :  { %283 = shalt.err (!%p280_p2)
}
  0xf1   :  { %s284_s3 = scalar_lea.hbm %s417_s5, 256 }
  0xf2   :  { %p285_p3 = scmp.ne.s32.totalorder %s417_s5, %s284_s3  ;;  %p288_p4 = scmp.lt.u32.totalorder %s284_s3, %s417_s5 }
  0xf4   :  { %p290_p5 = pnand %p288_p4, %p285_p3 }
  0xf6   :  { %293 = shalt.err (!%p290_p5)
}
  0xf7   :  { %142 = dma.vmem_to_hbm [thread:$0]  %s140_s24, 256, %s417_s5, [#allocation4]  }
  0xf8   :  { %300 = dma.done.wait [#allocation4], 256  }
  0xf9   :  { %301 = vsyncadd [#allocation4], 4294967040 }
  0xfa   :  { %146 = vsyncpa [#allocation3], 1 }
  0xfb   :  { %147 = vsyncpa [#allocation6], 1 }
  0xfc   :  { %148 = vsyncpa [#allocation9], 1 }
  0xfd   :  { %149 = vsyncpa [#allocation4], 1 }

</bundles_post_ra>
